<compile_context>
chip_gen: v6e
topology: v6e:2x2x1
jax: 0.10.0
libtpu: 0.0.40
codegen_flags: <defaults>
</compile_context>

<pallas_src>
import jax
import jax.numpy as jnp
from jax.experimental import pallas as pl
from jax.experimental.pallas import tpu as pltpu


# ----------------------------------------------------------------------------
# Kernel: one batch tile (tm rows) x one hiddim block (th cols of W1 / rows of
# W2).  ReLU is elementwise over hidden units, so blocking hiddim is exact.
# ----------------------------------------------------------------------------
def mlp_kernel(x_ref, w1_ref, b1_ref, w2_ref, b2_ref, o_ref, acc_ref):
    k = pl.program_id(1)

    @pl.when(k == 0)
    def _init():
        acc_ref[...] = jnp.zeros_like(acc_ref)

    # fc: x @ W1[:, k-block] + b1[k-block], ReLU.  f32 accumulation on the MXU.
    h = jnp.dot(x_ref[...], w1_ref[...], preferred_element_type=jnp.float32)
    h = jnp.maximum(h + b1_ref[...], 0.0)          # b1 pre-cast to f32

    # fc2 partial product: accumulate h @ W2[k-block, :] into f32 scratch.
    # (h is downcast to the weight dtype for the MXU; documented precision
    #  loss when weights are bf16.)
    acc_ref[...] += jnp.dot(h.astype(w2_ref.dtype), w2_ref[...],
                            preferred_element_type=jnp.float32)

    @pl.when(k == pl.num_programs(1) - 1)
    def _finalize():
        o_ref[...] = (acc_ref[...] + b2_ref[...]).astype(o_ref.dtype)

    # TODO(synk): dropout (dropout=False default) and the output_each_layer /
    #             LeakyReLU branch are not exercised in the default forward.


# ----------------------------------------------------------------------------
# Wrapper helpers
# ----------------------------------------------------------------------------
def _round_up(n: int, m: int) -> int:
    return ((n + m - 1) // m) * m


def _pad2d(a, rows, cols):
    """Zero-pad a 2D array; no-op (no copy) when already the target shape."""
    r, c = a.shape
    if r == rows and c == cols:
        return a
    return jnp.pad(a, ((0, rows - r), (0, cols - c)))


def _vmem_capacity_bytes() -> int:
    try:
        return int(pltpu.get_tpu_info().vmem_capacity_bytes)
    except Exception:
        return 64 << 20  # conservative per-TensorCore floor (v7x)


def _plan_bytes(tm, in_p, th, out_p, nk, act_isz, w_isz):
    """Rough per-core VMEM footprint of the tile plan."""
    wbuf = 1 if nk == 1 else 2          # resident single-buffered / streamed 2x
    x_bytes = 2 * tm * in_p * act_isz   # double-buffered activation stream
    o_bytes = 2 * tm * out_p * act_isz
    w1_bytes = wbuf * in_p * th * w_isz
    b1_bytes = wbuf * th * 4
    w2_bytes = wbuf * th * out_p * w_isz
    b2_bytes = out_p * 4
    acc_bytes = tm * out_p * 4          # f32 accumulator scratch
    h_bytes = tm * th * 4               # f32 intermediate
    return (x_bytes + o_bytes + w1_bytes + b1_bytes + w2_bytes + b2_bytes
            + acc_bytes + h_bytes)


def _choose_tiles(B, in_p, hid_p, out_p, act_isz, w_isz, vmem_cap):
    """Pick (tm, th): batch tile and hiddim block width, fitting VMEM."""
    if B <= 128:
        # Single-shot weight load; pipelining would not pay off anyway.
        tm_cands = [max(8, _round_up(B, 8))]
    else:
        # Minimize batch-pad overshoot, prefer larger tiles on ties.
        tm_cands = sorted((512, 256, 128),
                          key=lambda t: (_round_up(B, t) - B, -t))

    th_cands = []
    for t in (hid_p, 1024, 512, 256, 128):
        if t <= hid_p and t not in th_cands:
            th_cands.append(t)          # prefer fully-resident weights first

    budget = int(vmem_cap * 0.75)       # headroom for compiler internals / DMA
    for tm in tm_cands:
        for th in th_cands:
            nk = _round_up(hid_p, th) // th
            if _plan_bytes(tm, in_p, th, out_p, nk, act_isz, w_isz) <= budget:
                return tm, th
    return min(tm_cands), 128           # best effort fallback


def _build_specs(tm, in_p, th, out_p, nk, use_buffered):
    def spec(shape, index_map, buffers):
        if use_buffered and buffers is not None:
            return pl.BlockSpec(shape, index_map,
                                pipeline_mode=pl.Buffered(buffers))
        return pl.BlockSpec(shape, index_map)

    # Constant-index blocks are single-buffered; streamed blocks keep the
    # default double buffer.
    resident = 1
    stream_w = 1 if nk == 1 else None

    in_specs = [
        spec((tm, in_p), lambda i, k: (i, 0), None),      # streamed x tile
        spec((in_p, th), lambda i, k: (0, k), stream_w),  # W1 column block
        spec((1, th), lambda i, k: (0, k), stream_w),     # b1 block (f32)
        spec((th, out_p), lambda i, k: (k, 0), stream_w), # W2 row block
        spec((1, out_p), lambda i, k: (0, 0), resident),  # b2 (f32, resident)
    ]
    out_specs = pl.BlockSpec((tm, out_p), lambda i, k: (i, 0))
    return in_specs, out_specs


# ----------------------------------------------------------------------------
# Forward
# ----------------------------------------------------------------------------
def mlp_forward(x, w1, b1, w2, b2, *, compute_dtype=None):
    """relu(x @ w1 + b1) @ w2 + b2.

    x:(B, indim); w1:(indim, hiddim); b1:(hiddim,)|(1,hiddim);
    w2:(hiddim, outdim); b2:(outdim,)|(1,outdim). Returns (B, outdim) in
    x.dtype.  Weights are stored transposed relative to torch.nn.Linear.
    """
    B, indim = x.shape
    hiddim = w1.shape[1]
    outdim = w2.shape[1]
    out_dtype = x.dtype

    # MXU operand dtype: bf16 by default when given f32 (v6e/v7x MXU peak is
    # bf16-only; accumulation stays f32).  Pass compute_dtype=jnp.float32 to
    # force exact f32 operands.
    if compute_dtype is None:
        compute_dtype = jnp.bfloat16 if x.dtype == jnp.float32 else x.dtype
    act_isz = jnp.dtype(compute_dtype).itemsize
    w_isz = act_isz

    # Lane alignment: 256 keeps the 256x256 MXUs fully fed; use it when it is
    # free or the dim is large enough that the waste is negligible.
    def _align(d):
        a128 = _round_up(d, 128)
        if d >= 1024 or a128 % 256 == 0:
            return _round_up(d, 256)
        return a128

    in_p = _align(indim)
    hid_p = _align(hiddim)
    out_p = _round_up(outdim, 128)

    cap = _vmem_capacity_bytes()
    tm, th = _choose_tiles(B, in_p, hid_p, out_p, act_isz, w_isz, cap)
    hid_pp = _round_up(hid_p, th)
    nk = hid_pp // th
    b_p = _round_up(B, tm)
    nb = b_p // tm
    grid = (nb, nk)

    # Padding + dtype prep: all of these are no-op (no copy) when the caller's
    # shapes are already aligned; do weight prep once outside a hot loop (or
    # under jit) so it is not re-materialized per call.
    x_p = _pad2d(x.astype(compute_dtype), b_p, in_p)
    w1_p = _pad2d(w1.astype(compute_dtype), in_p, hid_pp)
    w2_p = _pad2d(w2.astype(compute_dtype), hid_pp, out_p)
    b1_p = _pad2d(jnp.reshape(b1, (1, -1)).astype(jnp.float32), 1, hid_pp)
    b2_p = _pad2d(jnp.reshape(b2, (1, -1)).astype(jnp.float32), 1, out_p)

    # VMEM limit tied to the actual plan, capped at the per-chip capacity
    # (64 MiB/TC on v7x, 128 MiB on v5e/v6e).
    plan = _plan_bytes(tm, in_p, th, out_p, nk, act_isz, w_isz)
    vmem_limit = min(cap - (2 << 20),
                     max(16 << 20, int(plan * 1.4) + (4 << 20)))

    flops = 2 * b_p * in_p * hid_pp + 2 * b_p * hid_pp * out_p
    bytes_accessed = (x_p.size * act_isz + w1_p.size * w_isz
                      + w2_p.size * w_isz + b1_p.size * 4 + b2_p.size * 4
                      + b_p * out_p * jnp.dtype(out_dtype).itemsize)
    cost = pl.CostEstimate(flops=int(flops), transcendentals=0,
                           bytes_accessed=int(bytes_accessed))

    def run(use_buffered):
        in_specs, out_specs = _build_specs(tm, in_p, th, out_p, nk,
                                           use_buffered)
        return pl.pallas_call(
            mlp_kernel,
            out_shape=jax.ShapeDtypeStruct((b_p, out_p), out_dtype),
            grid_spec=pltpu.PrefetchScalarGridSpec(
                num_scalar_prefetch=0,
                grid=grid,
                in_specs=in_specs,
                out_specs=out_specs,
                scratch_shapes=[pltpu.VMEM((tm, out_p), jnp.float32)],
            ),
            compiler_params=pltpu.CompilerParams(
                # batch axis parallel (megacore on v7x), hiddim reduction
                # axis arbitrary (accumulator).
                dimension_semantics=("parallel", "arbitrary"),
                vmem_limit_bytes=int(vmem_limit),
            ),
            cost_estimate=cost,
        )(x_p, w1_p, b1_p, w2_p, b2_p)

    try:
        out_padded = run(True)
    except Exception:
        # pipeline_mode=pl.Buffered not supported by this Pallas build; fall
        # back to default buffering (still correct, slightly more VMEM).
        out_padded = run(False)

    return out_padded[:B, :outdim]


def init_linear_params(key, in_features, out_features, dtype=jnp.float32):
    """PyTorch nn.Linear default init: U(-1/sqrt(in), 1/sqrt(in)).
    Weights stored transposed relative to PyTorch: (in_features, out_features)."""
    kw, kb = jax.random.split(key)
    bound = 1.0 / (in_features ** 0.5)
    w = jax.random.uniform(kw, (in_features, out_features), dtype,
                           minval=-bound, maxval=bound)
    b = jax.random.uniform(kb, (1, out_features), dtype,
                           minval=-bound, maxval=bound)
    return w, b


if __name__ == "__main__":
    key = jax.random.PRNGKey(0)
    k_x, k_fc, k_fc2 = jax.random.split(key, 3)

    # Small toy shapes consistent with the module; the wrapper pads to
    # (8,128)/256 alignment, so the kernel only pays off at production sizes.
    batch, indim, hiddim, outdim = 8, 16, 32, 1

    x = jax.random.normal(k_x, (batch, indim), dtype=jnp.float32)
    w1, b1 = init_linear_params(k_fc, indim, hiddim)
    w2, b2 = init_linear_params(k_fc2, hiddim, outdim)

    # Pure-JAX reference
    ref = jnp.maximum(x @ w1 + b1, 0.0) @ w2 + b2

    # Exact f32 MXU-operand path (tight tolerance).
    out_f32 = mlp_forward(x, w1, b1, w2, b2, compute_dtype=jnp.float32)
    jax.block_until_ready(out_f32)
    assert out_f32.shape == (batch, outdim)
    assert jnp.allclose(out_f32, ref, atol=1e-5, rtol=1e-5)

    # Default path: f32 inputs cast to bf16 MXU operands, f32 accumulation.
    out_bf16 = mlp_forward(x, w1, b1, w2, b2)
    jax.block_until_ready(out_bf16)
    assert out_bf16.shape == (batch, outdim)
    assert jnp.allclose(out_bf16, ref, atol=5e-2, rtol=5e-2)

    print("KERNEL_OK")
</pallas_src>

<mosaic_0001>
module attributes {stable_mosaic.version = 11 : i64} {
  func.func @mlp_kernel(%arg0: i32, %arg1: i32, %arg2: memref<8x128xf32, #tpu.memory_space<vmem>>, %arg3: memref<128x128xf32, #tpu.memory_space<vmem>>, %arg4: memref<1x128xf32, #tpu.memory_space<vmem>>, %arg5: memref<128x128xf32, #tpu.memory_space<vmem>>, %arg6: memref<1x128xf32, #tpu.memory_space<vmem>>, %arg7: memref<8x128xf32, #tpu.memory_space<vmem>>, %arg8: memref<8x128xf32, #tpu.memory_space<vmem>>) attributes {dimension_semantics = [#tpu.dimension_semantics<parallel>, #tpu.dimension_semantics<arbitrary>], iteration_bounds = array<i64: 1, 1>, scalar_prefetch = 0 : i64, scratch_operands = 1 : i64, tpu.core_type = #tpu.core_type<tc>, window_params = [{transform_indices = @transform_0, window_bounds = array<i64: 8, 128>}, {pipeline_mode = #tpu.pipeline_mode<synchronous>, transform_indices = @transform_1, window_bounds = array<i64: 128, 128>}, {pipeline_mode = #tpu.pipeline_mode<synchronous>, transform_indices = @transform_2, window_bounds = array<i64: 1, 128>}, {pipeline_mode = #tpu.pipeline_mode<synchronous>, transform_indices = @transform_3, window_bounds = array<i64: 128, 128>}, {pipeline_mode = #tpu.pipeline_mode<synchronous>, transform_indices = @transform_4, window_bounds = array<i64: 1, 128>}, {transform_indices = @transform_5, window_bounds = array<i64: 8, 128>}]} {
    %c0_i32 = arith.constant 0 : i32
    %0 = arith.cmpi eq, %arg1, %c0_i32 : i32
    %1 = arith.extui %0 : i1 to i32
    %c0_i32_0 = arith.constant 0 : i32
    %2 = arith.cmpi ne, %1, %c0_i32_0 : i32
    scf.if %2 {
      %cst_16 = arith.constant 0.000000e+00 : f32
      %19 = vector.broadcast %cst_16 : f32 to vector<8x128xf32>
      %c0_17 = arith.constant 0 : index
      %c0_18 = arith.constant 0 : index
      %20 = vector.load %arg8[%c0_17, %c0_18] : memref<8x128xf32, #tpu.memory_space<vmem>>, vector<8x128xf32>
      tpu.vector_store %arg8[%c0_17, %c0_18], %19 {strides = array<i32>} : memref<8x128xf32, #tpu.memory_space<vmem>>, vector<8x128xf32>,
    } else {
    }
    %c0 = arith.constant 0 : index
    %c0_1 = arith.constant 0 : index
    %3 = vector.load %arg2[%c0, %c0_1] : memref<8x128xf32, #tpu.memory_space<vmem>>, vector<8x128xf32>
    %c0_2 = arith.constant 0 : index
    %c0_3 = arith.constant 0 : index
    %4 = vector.load %arg3[%c0_2, %c0_3] : memref<128x128xf32, #tpu.memory_space<vmem>>, vector<128x128xf32>
    %cst = arith.constant dense<0.000000e+00> : vector<8x128xf32>
    %5 = tpu.matmul %3, %4, %cst {dimension_numbers = #tpu.dot_dimension_numbers<[1], [0], [0], [1], [0, 0, 1, 1], [], []>} : vector<8x128xf32>, vector<128x128xf32>, vector<8x128xf32> -> vector<8x128xf32>
    %c0_4 = arith.constant 0 : index
    %c0_5 = arith.constant 0 : index
    %6 = vector.load %arg4[%c0_4, %c0_5] : memref<1x128xf32, #tpu.memory_space<vmem>>, vector<1x128xf32>
    %7 = vector.broadcast %6 : vector<1x128xf32> to vector<8x128xf32>
    %8 = arith.addf %5, %7 : vector<8x128xf32>
    %cst_6 = arith.constant 0.000000e+00 : f32
    %9 = vector.broadcast %cst_6 : f32 to vector<8x128xf32>
    %10 = arith.maximumf %8, %9 : vector<8x128xf32>
    %c0_7 = arith.constant 0 : index
    %c0_8 = arith.constant 0 : index
    %11 = vector.load %arg8[%c0_7, %c0_8] : memref<8x128xf32, #tpu.memory_space<vmem>>, vector<8x128xf32>
    %c0_9 = arith.constant 0 : index
    %c0_10 = arith.constant 0 : index
    %12 = vector.load %arg5[%c0_9, %c0_10] : memref<128x128xf32, #tpu.memory_space<vmem>>, vector<128x128xf32>
    %cst_11 = arith.constant dense<0.000000e+00> : vector<8x128xf32>
    %13 = tpu.matmul %10, %12, %cst_11 {dimension_numbers = #tpu.dot_dimension_numbers<[1], [0], [0], [1], [0, 0, 1, 1], [], []>} : vector<8x128xf32>, vector<128x128xf32>, vector<8x128xf32> -> vector<8x128xf32>
    %14 = arith.addf %11, %13 : vector<8x128xf32>
    %c0_12 = arith.constant 0 : index
    %c0_13 = arith.constant 0 : index
    %15 = vector.load %arg8[%c0_12, %c0_13] : memref<8x128xf32, #tpu.memory_space<vmem>>, vector<8x128xf32>
    tpu.vector_store %arg8[%c0_12, %c0_13], %14 {strides = array<i32>} : memref<8x128xf32, #tpu.memory_space<vmem>>, vector<8x128xf32>,
    %c0_i32_14 = arith.constant 0 : i32
    %16 = arith.cmpi eq, %arg1, %c0_i32_14 : i32
    %17 = arith.extui %16 : i1 to i32
    %c0_i32_15 = arith.constant 0 : i32
    %18 = arith.cmpi ne, %17, %c0_i32_15 : i32
    scf.if %18 {
      %c0_16 = arith.constant 0 : index
      %c0_17 = arith.constant 0 : index
      %19 = vector.load %arg8[%c0_16, %c0_17] : memref<8x128xf32, #tpu.memory_space<vmem>>, vector<8x128xf32>
      %c0_18 = arith.constant 0 : index
      %c0_19 = arith.constant 0 : index
      %20 = vector.load %arg6[%c0_18, %c0_19] : memref<1x128xf32, #tpu.memory_space<vmem>>, vector<1x128xf32>
      %21 = vector.broadcast %20 : vector<1x128xf32> to vector<8x128xf32>
      %22 = arith.addf %19, %21 : vector<8x128xf32>
      %c0_20 = arith.constant 0 : index
      %c0_21 = arith.constant 0 : index
      %23 = vector.load %arg7[%c0_20, %c0_21] : memref<8x128xf32, #tpu.memory_space<vmem>>, vector<8x128xf32>
      tpu.vector_store %arg7[%c0_20, %c0_21], %22 {strides = array<i32>} : memref<8x128xf32, #tpu.memory_space<vmem>>, vector<8x128xf32>,
    } else {
    }
    return
  }
  func.func @transform_0(%arg0: i32, %arg1: i32) -> (i32, i32) {
    %c0_i32 = arith.constant 0 : i32
    %c0_i32_0 = arith.constant 0 : i32
    return %arg0, %c0_i32 : i32, i32
  }
  func.func @transform_1(%arg0: i32, %arg1: i32) -> (i32, i32) {
    %c0_i32 = arith.constant 0 : i32
    %c0_i32_0 = arith.constant 0 : i32
    return %c0_i32, %arg1 : i32, i32
  }
  func.func @transform_2(%arg0: i32, %arg1: i32) -> (i32, i32) {
    %c0_i32 = arith.constant 0 : i32
    %c0_i32_0 = arith.constant 0 : i32
    return %c0_i32, %arg1 : i32, i32
  }
  func.func @transform_3(%arg0: i32, %arg1: i32) -> (i32, i32) {
    %c0_i32 = arith.constant 0 : i32
    %c0_i32_0 = arith.constant 0 : i32
    return %arg1, %c0_i32 : i32, i32
  }
  func.func @transform_4(%arg0: i32, %arg1: i32) -> (i32, i32) {
    %c0_i32 = arith.constant 0 : i32
    %c0_i32_0 = arith.constant 0 : i32
    %c0_i32_1 = arith.constant 0 : i32
    return %c0_i32, %c0_i32_0 : i32, i32
  }
  func.func @transform_5(%arg0: i32, %arg1: i32) -> (i32, i32) {
    %c0_i32 = arith.constant 0 : i32
    %c0_i32_0 = arith.constant 0 : i32
    return %arg0, %c0_i32 : i32, i32
  }
}

module attributes {stable_mosaic.version = 11 : i64} {
  func.func @mlp_kernel(%arg0: i32, %arg1: i32, %arg2: memref<8x128xf32, #tpu.memory_space<vmem>>, %arg3: memref<128x128xf32, #tpu.memory_space<vmem>>, %arg4: memref<1x128xf32, #tpu.memory_space<vmem>>, %arg5: memref<128x128xf32, #tpu.memory_space<vmem>>, %arg6: memref<1x128xf32, #tpu.memory_space<vmem>>, %arg7: memref<8x128xf32, #tpu.memory_space<vmem>>, %arg8: memref<8x128xf32, #tpu.memory_space<vmem>>) attributes {dimension_semantics = [#tpu.dimension_semantics<parallel>, #tpu.dimension_semantics<arbitrary>], iteration_bounds = array<i64: 1, 1>, scalar_prefetch = 0 : i64, scratch_operands = 1 : i64, tpu.core_type = #tpu.core_type<tc>, window_params = [{transform_indices = @transform_0, window_bounds = array<i64: 8, 128>}, {transform_indices = @transform_1, window_bounds = array<i64: 128, 128>}, {transform_indices = @transform_2, window_bounds = array<i64: 1, 128>}, {transform_indices = @transform_3, window_bounds = array<i64: 128, 128>}, {pipeline_mode = #tpu.pipeline_mode<synchronous>, transform_indices = @transform_4, window_bounds = array<i64: 1, 128>}, {transform_indices = @transform_5, window_bounds = array<i64: 8, 128>}]} {
    %c0_i32 = arith.constant 0 : i32
    %0 = arith.cmpi eq, %arg1, %c0_i32 : i32
    %1 = arith.extui %0 : i1 to i32
    %c0_i32_0 = arith.constant 0 : i32
    %2 = arith.cmpi ne, %1, %c0_i32_0 : i32
    scf.if %2 {
      %cst_16 = arith.constant 0.000000e+00 : f32
      %19 = vector.broadcast %cst_16 : f32 to vector<8x128xf32>
      %c0_17 = arith.constant 0 : index
      %c0_18 = arith.constant 0 : index
      %20 = vector.load %arg8[%c0_17, %c0_18] : memref<8x128xf32, #tpu.memory_space<vmem>>, vector<8x128xf32>
      tpu.vector_store %arg8[%c0_17, %c0_18], %19 {strides = array<i32>} : memref<8x128xf32, #tpu.memory_space<vmem>>, vector<8x128xf32>,
    } else {
    }
    %c0 = arith.constant 0 : index
    %c0_1 = arith.constant 0 : index
    %3 = vector.load %arg2[%c0, %c0_1] : memref<8x128xf32, #tpu.memory_space<vmem>>, vector<8x128xf32>
    %c0_2 = arith.constant 0 : index
    %c0_3 = arith.constant 0 : index
    %4 = vector.load %arg3[%c0_2, %c0_3] : memref<128x128xf32, #tpu.memory_space<vmem>>, vector<128x128xf32>
    %cst = arith.constant dense<0.000000e+00> : vector<8x128xf32>
    %5 = tpu.matmul %3, %4, %cst {dimension_numbers = #tpu.dot_dimension_numbers<[1], [0], [0], [1], [0, 0, 1, 1], [], []>} : vector<8x128xf32>, vector<128x128xf32>, vector<8x128xf32> -> vector<8x128xf32>
    %c0_4 = arith.constant 0 : index
    %c0_5 = arith.constant 0 : index
    %6 = vector.load %arg4[%c0_4, %c0_5] : memref<1x128xf32, #tpu.memory_space<vmem>>, vector<1x128xf32>
    %7 = vector.broadcast %6 : vector<1x128xf32> to vector<8x128xf32>
    %8 = arith.addf %5, %7 : vector<8x128xf32>
    %cst_6 = arith.constant 0.000000e+00 : f32
    %9 = vector.broadcast %cst_6 : f32 to vector<8x128xf32>
    %10 = arith.maximumf %8, %9 : vector<8x128xf32>
    %c0_7 = arith.constant 0 : index
    %c0_8 = arith.constant 0 : index
    %11 = vector.load %arg8[%c0_7, %c0_8] : memref<8x128xf32, #tpu.memory_space<vmem>>, vector<8x128xf32>
    %c0_9 = arith.constant 0 : index
    %c0_10 = arith.constant 0 : index
    %12 = vector.load %arg5[%c0_9, %c0_10] : memref<128x128xf32, #tpu.memory_space<vmem>>, vector<128x128xf32>
    %cst_11 = arith.constant dense<0.000000e+00> : vector<8x128xf32>
    %13 = tpu.matmul %10, %12, %cst_11 {dimension_numbers = #tpu.dot_dimension_numbers<[1], [0], [0], [1], [0, 0, 1, 1], [], []>} : vector<8x128xf32>, vector<128x128xf32>, vector<8x128xf32> -> vector<8x128xf32>
    %14 = arith.addf %11, %13 : vector<8x128xf32>
    %c0_12 = arith.constant 0 : index
    %c0_13 = arith.constant 0 : index
    %15 = vector.load %arg8[%c0_12, %c0_13] : memref<8x128xf32, #tpu.memory_space<vmem>>, vector<8x128xf32>
    tpu.vector_store %arg8[%c0_12, %c0_13], %14 {strides = array<i32>} : memref<8x128xf32, #tpu.memory_space<vmem>>, vector<8x128xf32>,
    %c0_i32_14 = arith.constant 0 : i32
    %16 = arith.cmpi eq, %arg1, %c0_i32_14 : i32
    %17 = arith.extui %16 : i1 to i32
    %c0_i32_15 = arith.constant 0 : i32
    %18 = arith.cmpi ne, %17, %c0_i32_15 : i32
    scf.if %18 {
      %c0_16 = arith.constant 0 : index
      %c0_17 = arith.constant 0 : index
      %19 = vector.load %arg8[%c0_16, %c0_17] : memref<8x128xf32, #tpu.memory_space<vmem>>, vector<8x128xf32>
      %c0_18 = arith.constant 0 : index
      %c0_19 = arith.constant 0 : index
      %20 = vector.load %arg6[%c0_18, %c0_19] : memref<1x128xf32, #tpu.memory_space<vmem>>, vector<1x128xf32>
      %21 = vector.broadcast %20 : vector<1x128xf32> to vector<8x128xf32>
      %22 = arith.addf %19, %21 : vector<8x128xf32>
      %c0_20 = arith.constant 0 : index
      %c0_21 = arith.constant 0 : index
      %23 = vector.load %arg7[%c0_20, %c0_21] : memref<8x128xf32, #tpu.memory_space<vmem>>, vector<8x128xf32>
      tpu.vector_store %arg7[%c0_20, %c0_21], %22 {strides = array<i32>} : memref<8x128xf32, #tpu.memory_space<vmem>>, vector<8x128xf32>,
    } else {
    }
    return
  }
  func.func @transform_0(%arg0: i32, %arg1: i32) -> (i32, i32) {
    %c0_i32 = arith.constant 0 : i32
    %c0_i32_0 = arith.constant 0 : i32
    return %arg0, %c0_i32 : i32, i32
  }
  func.func @transform_1(%arg0: i32, %arg1: i32) -> (i32, i32) {
    %c0_i32 = arith.constant 0 : i32
    %c0_i32_0 = arith.constant 0 : i32
    return %c0_i32, %arg1 : i32, i32
  }
  func.func @transform_2(%arg0: i32, %arg1: i32) -> (i32, i32) {
    %c0_i32 = arith.constant 0 : i32
    %c0_i32_0 = arith.constant 0 : i32
    return %c0_i32, %arg1 : i32, i32
  }
  func.func @transform_3(%arg0: i32, %arg1: i32) -> (i32, i32) {
    %c0_i32 = arith.constant 0 : i32
    %c0_i32_0 = arith.constant 0 : i32
    return %arg1, %c0_i32 : i32, i32
  }
  func.func @transform_4(%arg0: i32, %arg1: i32) -> (i32, i32) {
    %c0_i32 = arith.constant 0 : i32
    %c0_i32_0 = arith.constant 0 : i32
    %c0_i32_1 = arith.constant 0 : i32
    return %c0_i32, %c0_i32_0 : i32, i32
  }
  func.func @transform_5(%arg0: i32, %arg1: i32) -> (i32, i32) {
    %c0_i32 = arith.constant 0 : i32
    %c0_i32_0 = arith.constant 0 : i32
    return %arg0, %c0_i32 : i32, i32
  }
}

</mosaic_0001>

<bundles_post_ra>
// kernel: tpu_custom_call.1
= control target key start
LH: loop header
LB: loop body
LE: loop exit
PB: predicated region body
PF: predicated region fallthrough
CT: control target
= control target key end

     0   :  { %10 = vsyncpa [#allocation4], 0  ;;  %s568_s0 = inlined_call_operand.hbm [shape: f32[8,128], index: 0, kind: input, shape index: {}]   ;;  %s569_s1 = inlined_call_operand.hbm [shape: f32[128,128], index: 1, kind: input, shape index: {}]   ;;  %s570_s2 = inlined_call_operand.vmem [shape: f32[1,128], index: 2, kind: input, shape index: {}]   ;;  %s571_s3 = inlined_call_operand.hbm [shape: f32[128,128], index: 3, kind: input, shape index: {}]   ;;  %s572_s4 = inlined_call_operand.vmem [shape: f32[1,128], index: 4, kind: input, shape index: {}]   ;;  %s573_s5 = inlined_call_operand.hbm [shape: f32[8,128], index: 5, kind: output, shape index: {}]  }
   0x1   :  { %11 = vsyncpa [#allocation7], 0 }
   0x2   :  { %12 = vsyncpa [#allocation5], 0  ;;  %s478_s18 = smov [#allocation6]  }
   0x3   :  { %s28_s19 = sshll.u32 %s478_s18, 4  ;;  %s29_s19 = int_to_ptr.vmem [resolvable:$true] %s28_s19 }
   0x4   :  { %s400_s20 = scalar_lea.vmem %s29_s19, 2048  ;;  %p405_p1 = scmp.lt.s32.totalorder %s29_s19, %s29_s19 }
   0x5   :  { %p401_p0 = scmp.ne.s32.totalorder %s29_s19, %s400_s20  ;;  %p406_p2 = scmp.lt.s32.totalorder %s400_s20, %s400_s20 }
   0x7   :  { %p407_p3 = por %p406_p2, %p405_p1 }
   0x9   :  { %p408_p4 = pnand %p407_p3, %p401_p0 }
   0xb   :  { %411 = shalt.err (!%p408_p4)
}
   0xc   :  { %s479_s21 = smov 128   ;;  %s480_s22 = smov 8  }
   0xd   :  { %34 = dma.hbm_to_vmem [thread:$0]  %s569_s1, 2048, %s29_s19, [#allocation7], %s479_s21, %s479_s21, %s480_s22  }
   0xe   :  { %s481_s25 = smov [#allocation3]   ;;  %s482_s27 = smov [#allocation8]  }
   0xf   :  { %s19_s26 = sshll.u32 %s481_s25, 4  ;;  %s42_s28 = sshll.u32 %s482_s27, 4  ;;  %s20_s26 = int_to_ptr.vmem [resolvable:$true] %s19_s26  ;;  %s43_s28 = int_to_ptr.vmem [resolvable:$true] %s42_s28 }
  0x10   :  { %s420_s29 = scalar_lea.vmem %s20_s26, 128  ;;  %p425_p6 = scmp.lt.s32.totalorder %s20_s26, %s20_s26 }
  0x11   :  { %p421_p5 = scmp.ne.s32.totalorder %s20_s26, %s420_s29  ;;  %p426_p7 = scmp.lt.s32.totalorder %s420_s29, %s420_s29 }
  0x13   :  { %p427_p8 = por %p426_p7, %p425_p6 }
  0x15   :  { %p428_p9 = pnand %p427_p8, %p421_p5 }
  0x17   :  { %431 = shalt.err (!%p428_p9)
}
  0x18   :  { %22 = dma.hbm_to_vmem [thread:$0]  %s568_s0, 128, %s20_s26, [#allocation4]  }
  0x19   :  { %s440_s7 = scalar_lea.vmem %s43_s28, 2048  ;;  %p445_p11 = scmp.lt.s32.totalorder %s43_s28, %s43_s28 }
  0x1a   :  { %p441_p10 = scmp.ne.s32.totalorder %s43_s28, %s440_s7  ;;  %p446_p12 = scmp.lt.s32.totalorder %s440_s7, %s440_s7 }
  0x1c   :  { %p447_p13 = por %p446_p12, %p445_p11 }
  0x1e   :  { %p448_p0 = pnand %p447_p13, %p441_p10 }
  0x20   :  { %451 = shalt.err (!%p448_p0)
}
  0x21   :  { %48 = dma.hbm_to_vmem [thread:$0]  %s571_s3, 2048, %s43_s28, [#allocation7], %s479_s21, %s479_s21, %s480_s22  }
  0x22   :  { %472 = dma.done.wait [#allocation4], 128  }
  0x23   :  { %473 = vsyncadd [#allocation4], 4294967168 }
  0x24   :  { %474 = dma.done.wait [#allocation7], 4096  }
  0x25   :  { %475 = vsyncadd [#allocation7], 4294963200  ;;  %v483_v0 = vmov 0.0   ;;  %vm484_vm0 = vmmov 0   ;;  %v81_v1 = vld [vmem:[#allocation6 + $0x78] sm:$0xff]  ;;  %v80_v2 = vld [vmem:[#allocation6 + $0x70] sm:$0xff] }
  0x26   :  { %314 = vmatprep.subr.mxu0 %v483_v0  ;;  %346 = vmatprep.mubr.msk.f32.mxu0 %vm484_vm0, %v483_v0  ;;  %v79_v3 = vld [vmem:[#allocation6 + $0x68] sm:$0xff]  ;;  %v78_v4 = vld [vmem:[#allocation6 + $0x60] sm:$0xff]  ;;  %v176_v5 = vld [vmem:[#allocation8 + $0x78] sm:$0xff]  ;;  %s485_s11 = smov [#allocation9]  }
  0x27   :  { %349 = vmatprep.subr.mxu1 %v483_v0  ;;  %381 = vmatprep.mubr.msk.f32.mxu1 %vm484_vm0, %v483_v0  ;;  %v77_v6 = vld [vmem:[#allocation6 + $0x58] sm:$0xff]  ;;  %v175_v7 = vld [vmem:[#allocation8 + $0x70] sm:$0xff]  ;;  %v174_v8 = vld [vmem:[#allocation8 + $0x68] sm:$0xff]  ;;  %s268_s12 = sshll.u32 %s485_s11, 4  ;;  %s269_s12 = int_to_ptr.vmem [resolvable:$true] %s268_s12 }
  0x28   :  { %315 = vmatpush3.msra.mxu0 %v81_v1  ;;  %350 = vmatpush3.msra.mxu1 %v176_v5  ;;  %v76_v9 = vld [vmem:[#allocation6 + $0x50] sm:$0xff]  ;;  %v173_v10 = vld [vmem:[#allocation8 + $0x60] sm:$0xff]  ;;  %v75_v11 = vld [vmem:[#allocation6 + $0x48] sm:$0xff]  ;;  %s452_s13 = scalar_lea.vmem %s269_s12, 128  ;;  %p457_p2 = scmp.lt.s32.totalorder %s269_s12, %s269_s12 }
  0x29   :  { %316 = vmatprep.subr.mxu0 %v483_v0  ;;  %351 = vmatprep.subr.mxu1 %v483_v0  ;;  %v172_v12 = vld [vmem:[#allocation8 + $0x58] sm:$0xff]  ;;  %v74_v13 = vld [vmem:[#allocation6 + $0x40] sm:$0xff]  ;;  %v171_v14 = vld [vmem:[#allocation8 + $0x50] sm:$0xff]  ;;  %p453_p1 = scmp.ne.s32.totalorder %s269_s12, %s452_s13  ;;  %p458_p3 = scmp.lt.s32.totalorder %s452_s13, %s452_s13 }
  0x2a   :  { %317 = vmatpush3.msra.mxu0 %v80_v2  ;;  %352 = vmatpush3.msra.mxu1 %v175_v7  ;;  %v73_v15 = vld [vmem:[#allocation6 + $0x38] sm:$0xff]  ;;  %v170_v16 = vld [vmem:[#allocation8 + $0x48] sm:$0xff]  ;;  %v72_v17 = vld [vmem:[#allocation6 + $0x30] sm:$0xff] }
  0x2b   :  { %318 = vmatprep.subr.mxu0 %v483_v0  ;;  %353 = vmatprep.subr.mxu1 %v483_v0  ;;  %v169_v18 = vld [vmem:[#allocation8 + $0x40] sm:$0xff]  ;;  %v71_v19 = vld [vmem:[#allocation6 + $0x28] sm:$0xff]  ;;  %v168_v20 = vld [vmem:[#allocation8 + $0x38] sm:$0xff]  ;;  %p459_p4 = por %p458_p3, %p457_p2 }
  0x2c   :  { %319 = vmatpush3.msra.mxu0 %v79_v3  ;;  %354 = vmatpush3.msra.mxu1 %v174_v8  ;;  %v70_v21 = vld [vmem:[#allocation6 + $0x20] sm:$0xff]  ;;  %v167_v22 = vld [vmem:[#allocation8 + $0x30] sm:$0xff]  ;;  %v69_v23 = vld [vmem:[#allocation6 + $0x18] sm:$0xff] }
  0x2d   :  { %320 = vmatprep.subr.mxu0 %v483_v0  ;;  %355 = vmatprep.subr.mxu1 %v483_v0  ;;  %v166_v24 = vld [vmem:[#allocation8 + $0x28] sm:$0xff]  ;;  %v68_v25 = vld [vmem:[#allocation6 + $0x10] sm:$0xff]  ;;  %v165_v26 = vld [vmem:[#allocation8 + $0x20] sm:$0xff]  ;;  %p460_p5 = pnand %p459_p4, %p453_p1 }
  0x2e   :  { %321 = vmatpush3.msra.mxu0 %v78_v4  ;;  %356 = vmatpush3.msra.mxu1 %v173_v10  ;;  %v67_v27 = vld [vmem:[#allocation6 + $0x8] sm:$0xff]  ;;  %v164_v28 = vld [vmem:[#allocation8 + $0x18] sm:$0xff]  ;;  %v66_v29 = vld [vmem:[#allocation6] sm:$0xff] }
  0x2f   :  { %322 = vmatprep.subr.mxu0 %v483_v0  ;;  %357 = vmatprep.subr.mxu1 %v483_v0  ;;  %v65_v30 = vld [vmem:[#allocation3] sm:$0xff]  ;;  %v163_v31 = vld [vmem:[#allocation8 + $0x10] sm:$0xff]  ;;  %v162_v32 = vld [vmem:[#allocation8 + $0x8] sm:$0xff] }
  0x30   :  { %323 = vmatpush3.msra.mxu0 %v77_v6  ;;  %358 = vmatpush3.msra.mxu1 %v172_v12  ;;  %v161_v33 = vld [vmem:[#allocation8] sm:$0xff]  ;;  %v278_v34 = vld [vmem:[%s570_s2] ss:$0 sm:$0xff] }
  0x31   :  { %324 = vmatprep.subr.mxu0 %v483_v0  ;;  %359 = vmatprep.subr.mxu1 %v483_v0  ;;  %v279_v39 = vld [vmem:[%s572_s4] ss:$0 sm:$0xff] }
  0x32   :  { %325 = vmatpush3.msra.mxu0 %v76_v9  ;;  %360 = vmatpush3.msra.mxu1 %v171_v14 }
  0x33   :  { %326 = vmatprep.subr.mxu0 %v483_v0  ;;  %361 = vmatprep.subr.mxu1 %v483_v0 }
  0x34   :  { %327 = vmatpush3.msra.mxu0 %v75_v11  ;;  %362 = vmatpush3.msra.mxu1 %v170_v16 }
  0x35   :  { %328 = vmatprep.subr.mxu0 %v483_v0  ;;  %363 = vmatprep.subr.mxu1 %v483_v0 }
  0x36   :  { %329 = vmatpush3.msra.mxu0 %v74_v13  ;;  %364 = vmatpush3.msra.mxu1 %v169_v18 }
  0x37   :  { %330 = vmatprep.subr.mxu0 %v483_v0  ;;  %365 = vmatprep.subr.mxu1 %v483_v0 }
  0x38   :  { %331 = vmatpush3.msra.mxu0 %v73_v15  ;;  %366 = vmatpush3.msra.mxu1 %v168_v20 }
  0x39   :  { %332 = vmatprep.subr.mxu0 %v483_v0  ;;  %367 = vmatprep.subr.mxu1 %v483_v0 }
  0x3a   :  { %333 = vmatpush3.msra.mxu0 %v72_v17  ;;  %368 = vmatpush3.msra.mxu1 %v167_v22 }
  0x3b   :  { %334 = vmatprep.subr.mxu0 %v483_v0  ;;  %369 = vmatprep.subr.mxu1 %v483_v0 }
  0x3c   :  { %335 = vmatpush3.msra.mxu0 %v71_v19  ;;  %370 = vmatpush3.msra.mxu1 %v166_v24 }
  0x3d   :  { %336 = vmatprep.subr.mxu0 %v483_v0  ;;  %371 = vmatprep.subr.mxu1 %v483_v0 }
  0x3e   :  { %337 = vmatpush3.msra.mxu0 %v70_v21  ;;  %372 = vmatpush3.msra.mxu1 %v165_v26 }
  0x3f   :  { %338 = vmatprep.subr.mxu0 %v483_v0  ;;  %373 = vmatprep.subr.mxu1 %v483_v0 }
  0x40   :  { %339 = vmatpush3.msra.mxu0 %v69_v23  ;;  %374 = vmatpush3.msra.mxu1 %v164_v28 }
  0x41   :  { %340 = vmatprep.subr.mxu0 %v483_v0  ;;  %375 = vmatprep.subr.mxu1 %v483_v0 }
  0x42   :  { %341 = vmatpush3.msra.mxu0 %v68_v25  ;;  %376 = vmatpush3.msra.mxu1 %v163_v31 }
  0x43   :  { %342 = vmatprep.subr.mxu0 %v483_v0  ;;  %377 = vmatprep.subr.mxu1 %v483_v0 }
  0x44   :  { %343 = vmatpush3.msra.mxu0 %v67_v27  ;;  %378 = vmatpush3.msra.mxu1 %v162_v32 }
  0x45   :  { %344 = vmatprep.subr.mxu0 %v483_v0  ;;  %379 = vmatprep.subr.mxu1 %v483_v0 }
  0x46   :  { %345 = vmatpush3.msra.mxu0 %v66_v29  ;;  %380 = vmatpush3.msra.mxu1 %v161_v33 }
  0x47   :  { %347 = vmatmul.mubr.f32.vlgmr.msra.gmra.mxu0 %v65_v30 }
 0x107   :  { %v155_v35 = vpop.f32.mrf.mxu0 }
 0x108   :  { %v156_v36 = vadd.f32 %v278_v34, %v155_v35 }
 0x109   :  { %v348_v37 = vpop.f32.mrf.mxu0 }
 0x10a   :  { %v159_v38 = vmax.f32 %v156_v36, 0.0 }
 0x10c   :  { %382 = vmatmul.mubr.f32.vlgmr.msra.gmra.mxu1 %v159_v38 }
 0x1cc   :  { %v243_v40 = vpop.f32.mrf.mxu1 }
 0x1cd   :  { %v260_v41 = vadd.f32 %v279_v39, %v243_v40 }
 0x1ce   :  { %v383_v42 = vpop.f32.mrf.mxu1 }
 0x1cf   :  { %261 = vst [vmem:[#allocation9] sm:$0xff] %v260_v41 }
 0x1d0   :  { %463 = shalt.err (!%p460_p5)
}
 0x1d1   :  { %271 = dma.vmem_to_hbm [thread:$0]  %s269_s12, 128, %s573_s5, [#allocation5]  }
 0x1d2   :  { %476 = dma.done.wait [#allocation5], 128  }
 0x1d3   :  { %477 = vsyncadd [#allocation5], 4294967168 }
 0x1d4   :  { %275 = vsyncpa [#allocation4], 1 }
 0x1d5   :  { %276 = vsyncpa [#allocation7], 1 }
 0x1d6   :  { %277 = vsyncpa [#allocation5], 1 }

// kernel: tpu_custom_call.1
= control target key start
LH: loop header
LB: loop body
LE: loop exit
PB: predicated region body
PF: predicated region fallthrough
CT: control target
= control target key end

     0   :  { %10 = vsyncpa [#allocation4], 0  ;;  %s568_s0 = inlined_call_operand.hbm [shape: f32[8,128], index: 0, kind: input, shape index: {}]   ;;  %s569_s1 = inlined_call_operand.hbm [shape: f32[128,128], index: 1, kind: input, shape index: {}]   ;;  %s570_s2 = inlined_call_operand.vmem [shape: f32[1,128], index: 2, kind: input, shape index: {}]   ;;  %s571_s3 = inlined_call_operand.hbm [shape: f32[128,128], index: 3, kind: input, shape index: {}]   ;;  %s572_s4 = inlined_call_operand.vmem [shape: f32[1,128], index: 4, kind: input, shape index: {}]   ;;  %s573_s5 = inlined_call_operand.hbm [shape: f32[8,128], index: 5, kind: output, shape index: {}]  }
   0x1   :  { %11 = vsyncpa [#allocation7], 0 }
   0x2   :  { %12 = vsyncpa [#allocation5], 0  ;;  %s478_s18 = smov [#allocation6]  }
   0x3   :  { %s28_s19 = sshll.u32 %s478_s18, 4  ;;  %s29_s19 = int_to_ptr.vmem [resolvable:$true] %s28_s19 }
   0x4   :  { %s400_s20 = scalar_lea.vmem %s29_s19, 2048  ;;  %p405_p1 = scmp.lt.s32.totalorder %s29_s19, %s29_s19 }
   0x5   :  { %p401_p0 = scmp.ne.s32.totalorder %s29_s19, %s400_s20  ;;  %p406_p2 = scmp.lt.s32.totalorder %s400_s20, %s400_s20 }
   0x7   :  { %p407_p3 = por %p406_p2, %p405_p1 }
   0x9   :  { %p408_p4 = pnand %p407_p3, %p401_p0 }
   0xb   :  { %411 = shalt.err (!%p408_p4)
}
   0xc   :  { %s479_s21 = smov 128   ;;  %s480_s22 = smov 8  }
   0xd   :  { %34 = dma.hbm_to_vmem [thread:$0]  %s569_s1, 2048, %s29_s19, [#allocation7], %s479_s21, %s479_s21, %s480_s22  }
   0xe   :  { %s481_s25 = smov [#allocation3]   ;;  %s482_s27 = smov [#allocation8]  }
   0xf   :  { %s19_s26 = sshll.u32 %s481_s25, 4  ;;  %s42_s28 = sshll.u32 %s482_s27, 4  ;;  %s20_s26 = int_to_ptr.vmem [resolvable:$true] %s19_s26  ;;  %s43_s28 = int_to_ptr.vmem [resolvable:$true] %s42_s28 }
  0x10   :  { %s420_s29 = scalar_lea.vmem %s20_s26, 128  ;;  %p425_p6 = scmp.lt.s32.totalorder %s20_s26, %s20_s26 }
  0x11   :  { %p421_p5 = scmp.ne.s32.totalorder %s20_s26, %s420_s29  ;;  %p426_p7 = scmp.lt.s32.totalorder %s420_s29, %s420_s29 }
  0x13   :  { %p427_p8 = por %p426_p7, %p425_p6 }
  0x15   :  { %p428_p9 = pnand %p427_p8, %p421_p5 }
  0x17   :  { %431 = shalt.err (!%p428_p9)
}
  0x18   :  { %22 = dma.hbm_to_vmem [thread:$0]  %s568_s0, 128, %s20_s26, [#allocation4]  }
  0x19   :  { %s440_s7 = scalar_lea.vmem %s43_s28, 2048  ;;  %p445_p11 = scmp.lt.s32.totalorder %s43_s28, %s43_s28 }
  0x1a   :  { %p441_p10 = scmp.ne.s32.totalorder %s43_s28, %s440_s7  ;;  %p446_p12 = scmp.lt.s32.totalorder %s440_s7, %s440_s7 }
  0x1c   :  { %p447_p13 = por %p446_p12, %p445_p11 }
  0x1e   :  { %p448_p0 = pnand %p447_p13, %p441_p10 }
  0x20   :  { %451 = shalt.err (!%p448_p0)
}
  0x21   :  { %48 = dma.hbm_to_vmem [thread:$0]  %s571_s3, 2048, %s43_s28, [#allocation7], %s479_s21, %s479_s21, %s480_s22  }
  0x22   :  { %472 = dma.done.wait [#allocation4], 128  }
  0x23   :  { %473 = vsyncadd [#allocation4], 4294967168 }
  0x24   :  { %474 = dma.done.wait [#allocation7], 4096  }
  0x25   :  { %475 = vsyncadd [#allocation7], 4294963200  ;;  %v483_v0 = vmov 0.0   ;;  %vm484_vm0 = vmmov 0   ;;  %v81_v1 = vld [vmem:[#allocation6 + $0x78] sm:$0xff]  ;;  %v80_v2 = vld [vmem:[#allocation6 + $0x70] sm:$0xff] }
  0x26   :  { %314 = vmatprep.subr.mxu0 %v483_v0  ;;  %346 = vmatprep.mubr.msk.f32.mxu0 %vm484_vm0, %v483_v0  ;;  %v79_v3 = vld [vmem:[#allocation6 + $0x68] sm:$0xff]  ;;  %v78_v4 = vld [vmem:[#allocation6 + $0x60] sm:$0xff]  ;;  %v176_v5 = vld [vmem:[#allocation8 + $0x78] sm:$0xff]  ;;  %s485_s11 = smov [#allocation9]  }
  0x27   :  { %349 = vmatprep.subr.mxu1 %v483_v0  ;;  %381 = vmatprep.mubr.msk.f32.mxu1 %vm484_vm0, %v483_v0  ;;  %v77_v6 = vld [vmem:[#allocation6 + $0x58] sm:$0xff]  ;;  %v175_v7 = vld [vmem:[#allocation8 + $0x70] sm:$0xff]  ;;  %v174_v8 = vld [vmem:[#allocation8 + $0x68] sm:$0xff]  ;;  %s268_s12 = sshll.u32 %s485_s11, 4  ;;  %s269_s12 = int_to_ptr.vmem [resolvable:$true] %s268_s12 }
  0x28   :  { %315 = vmatpush3.msra.mxu0 %v81_v1  ;;  %350 = vmatpush3.msra.mxu1 %v176_v5  ;;  %v76_v9 = vld [vmem:[#allocation6 + $0x50] sm:$0xff]  ;;  %v173_v10 = vld [vmem:[#allocation8 + $0x60] sm:$0xff]  ;;  %v75_v11 = vld [vmem:[#allocation6 + $0x48] sm:$0xff]  ;;  %s452_s13 = scalar_lea.vmem %s269_s12, 128  ;;  %p457_p2 = scmp.lt.s32.totalorder %s269_s12, %s269_s12 }
  0x29   :  { %316 = vmatprep.subr.mxu0 %v483_v0  ;;  %351 = vmatprep.subr.mxu1 %v483_v0  ;;  %v172_v12 = vld [vmem:[#allocation8 + $0x58] sm:$0xff]  ;;  %v74_v13 = vld [vmem:[#allocation6 + $0x40] sm:$0xff]  ;;  %v171_v14 = vld [vmem:[#allocation8 + $0x50] sm:$0xff]  ;;  %p453_p1 = scmp.ne.s32.totalorder %s269_s12, %s452_s13  ;;  %p458_p3 = scmp.lt.s32.totalorder %s452_s13, %s452_s13 }
  0x2a   :  { %317 = vmatpush3.msra.mxu0 %v80_v2  ;;  %352 = vmatpush3.msra.mxu1 %v175_v7  ;;  %v73_v15 = vld [vmem:[#allocation6 + $0x38] sm:$0xff]  ;;  %v170_v16 = vld [vmem:[#allocation8 + $0x48] sm:$0xff]  ;;  %v72_v17 = vld [vmem:[#allocation6 + $0x30] sm:$0xff] }
  0x2b   :  { %318 = vmatprep.subr.mxu0 %v483_v0  ;;  %353 = vmatprep.subr.mxu1 %v483_v0  ;;  %v169_v18 = vld [vmem:[#allocation8 + $0x40] sm:$0xff]  ;;  %v71_v19 = vld [vmem:[#allocation6 + $0x28] sm:$0xff]  ;;  %v168_v20 = vld [vmem:[#allocation8 + $0x38] sm:$0xff]  ;;  %p459_p4 = por %p458_p3, %p457_p2 }
  0x2c   :  { %319 = vmatpush3.msra.mxu0 %v79_v3  ;;  %354 = vmatpush3.msra.mxu1 %v174_v8  ;;  %v70_v21 = vld [vmem:[#allocation6 + $0x20] sm:$0xff]  ;;  %v167_v22 = vld [vmem:[#allocation8 + $0x30] sm:$0xff]  ;;  %v69_v23 = vld [vmem:[#allocation6 + $0x18] sm:$0xff] }
  0x2d   :  { %320 = vmatprep.subr.mxu0 %v483_v0  ;;  %355 = vmatprep.subr.mxu1 %v483_v0  ;;  %v166_v24 = vld [vmem:[#allocation8 + $0x28] sm:$0xff]  ;;  %v68_v25 = vld [vmem:[#allocation6 + $0x10] sm:$0xff]  ;;  %v165_v26 = vld [vmem:[#allocation8 + $0x20] sm:$0xff]  ;;  %p460_p5 = pnand %p459_p4, %p453_p1 }
  0x2e   :  { %321 = vmatpush3.msra.mxu0 %v78_v4  ;;  %356 = vmatpush3.msra.mxu1 %v173_v10  ;;  %v67_v27 = vld [vmem:[#allocation6 + $0x8] sm:$0xff]  ;;  %v164_v28 = vld [vmem:[#allocation8 + $0x18] sm:$0xff]  ;;  %v66_v29 = vld [vmem:[#allocation6] sm:$0xff] }
  0x2f   :  { %322 = vmatprep.subr.mxu0 %v483_v0  ;;  %357 = vmatprep.subr.mxu1 %v483_v0  ;;  %v65_v30 = vld [vmem:[#allocation3] sm:$0xff]  ;;  %v163_v31 = vld [vmem:[#allocation8 + $0x10] sm:$0xff]  ;;  %v162_v32 = vld [vmem:[#allocation8 + $0x8] sm:$0xff] }
  0x30   :  { %323 = vmatpush3.msra.mxu0 %v77_v6  ;;  %358 = vmatpush3.msra.mxu1 %v172_v12  ;;  %v161_v33 = vld [vmem:[#allocation8] sm:$0xff]  ;;  %v278_v34 = vld [vmem:[%s570_s2] ss:$0 sm:$0xff] }
  0x31   :  { %324 = vmatprep.subr.mxu0 %v483_v0  ;;  %359 = vmatprep.subr.mxu1 %v483_v0  ;;  %v279_v39 = vld [vmem:[%s572_s4] ss:$0 sm:$0xff] }
  0x32   :  { %325 = vmatpush3.msra.mxu0 %v76_v9  ;;  %360 = vmatpush3.msra.mxu1 %v171_v14 }
  0x33   :  { %326 = vmatprep.subr.mxu0 %v483_v0  ;;  %361 = vmatprep.subr.mxu1 %v483_v0 }
  0x34   :  { %327 = vmatpush3.msra.mxu0 %v75_v11  ;;  %362 = vmatpush3.msra.mxu1 %v170_v16 }
  0x35   :  { %328 = vmatprep.subr.mxu0 %v483_v0  ;;  %363 = vmatprep.subr.mxu1 %v483_v0 }
  0x36   :  { %329 = vmatpush3.msra.mxu0 %v74_v13  ;;  %364 = vmatpush3.msra.mxu1 %v169_v18 }
  0x37   :  { %330 = vmatprep.subr.mxu0 %v483_v0  ;;  %365 = vmatprep.subr.mxu1 %v483_v0 }
  0x38   :  { %331 = vmatpush3.msra.mxu0 %v73_v15  ;;  %366 = vmatpush3.msra.mxu1 %v168_v20 }
  0x39   :  { %332 = vmatprep.subr.mxu0 %v483_v0  ;;  %367 = vmatprep.subr.mxu1 %v483_v0 }
  0x3a   :  { %333 = vmatpush3.msra.mxu0 %v72_v17  ;;  %368 = vmatpush3.msra.mxu1 %v167_v22 }
  0x3b   :  { %334 = vmatprep.subr.mxu0 %v483_v0  ;;  %369 = vmatprep.subr.mxu1 %v483_v0 }
  0x3c   :  { %335 = vmatpush3.msra.mxu0 %v71_v19  ;;  %370 = vmatpush3.msra.mxu1 %v166_v24 }
  0x3d   :  { %336 = vmatprep.subr.mxu0 %v483_v0  ;;  %371 = vmatprep.subr.mxu1 %v483_v0 }
  0x3e   :  { %337 = vmatpush3.msra.mxu0 %v70_v21  ;;  %372 = vmatpush3.msra.mxu1 %v165_v26 }
  0x3f   :  { %338 = vmatprep.subr.mxu0 %v483_v0  ;;  %373 = vmatprep.subr.mxu1 %v483_v0 }
  0x40   :  { %339 = vmatpush3.msra.mxu0 %v69_v23  ;;  %374 = vmatpush3.msra.mxu1 %v164_v28 }
  0x41   :  { %340 = vmatprep.subr.mxu0 %v483_v0  ;;  %375 = vmatprep.subr.mxu1 %v483_v0 }
  0x42   :  { %341 = vmatpush3.msra.mxu0 %v68_v25  ;;  %376 = vmatpush3.msra.mxu1 %v163_v31 }
  0x43   :  { %342 = vmatprep.subr.mxu0 %v483_v0  ;;  %377 = vmatprep.subr.mxu1 %v483_v0 }
  0x44   :  { %343 = vmatpush3.msra.mxu0 %v67_v27  ;;  %378 = vmatpush3.msra.mxu1 %v162_v32 }
  0x45   :  { %344 = vmatprep.subr.mxu0 %v483_v0  ;;  %379 = vmatprep.subr.mxu1 %v483_v0 }
  0x46   :  { %345 = vmatpush3.msra.mxu0 %v66_v29  ;;  %380 = vmatpush3.msra.mxu1 %v161_v33 }
  0x47   :  { %347 = vmatmul.mubr.f32.vlgmr.msra.gmra.mxu0 %v65_v30 }
 0x107   :  { %v155_v35 = vpop.f32.mrf.mxu0 }
 0x108   :  { %v156_v36 = vadd.f32 %v278_v34, %v155_v35 }
 0x109   :  { %v348_v37 = vpop.f32.mrf.mxu0 }
 0x10a   :  { %v159_v38 = vmax.f32 %v156_v36, 0.0 }
 0x10c   :  { %382 = vmatmul.mubr.f32.vlgmr.msra.gmra.mxu1 %v159_v38 }
 0x1cc   :  { %v243_v40 = vpop.f32.mrf.mxu1 }
 0x1cd   :  { %v260_v41 = vadd.f32 %v279_v39, %v243_v40 }
 0x1ce   :  { %v383_v42 = vpop.f32.mrf.mxu1 }
 0x1cf   :  { %261 = vst [vmem:[#allocation9] sm:$0xff] %v260_v41 }
 0x1d0   :  { %463 = shalt.err (!%p460_p5)
}
 0x1d1   :  { %271 = dma.vmem_to_hbm [thread:$0]  %s269_s12, 128, %s573_s5, [#allocation5]  }
 0x1d2   :  { %476 = dma.done.wait [#allocation5], 128  }
 0x1d3   :  { %477 = vsyncadd [#allocation5], 4294967168 }
 0x1d4   :  { %275 = vsyncpa [#allocation4], 1 }
 0x1d5   :  { %276 = vsyncpa [#allocation7], 1 }
 0x1d6   :  { %277 = vsyncpa [#allocation5], 1 }

</bundles_post_ra>
